<compile_context>
chip_gen: v7x
topology: tpu7x:2x2x1
jax: 0.10.0
libtpu: 0.0.40
codegen_flags: <defaults>
</compile_context>

<pallas_src>
import numpy as np
import jax
import jax.numpy as jnp
from jax.experimental import pallas as pl
from jax.experimental.pallas import tpu as pltpu


def ca_layer_kernel(x_ref, w1_ref, w2_ref, y_ref):
    """One batch element per grid step.

    x_ref : (1, C, HW)  float32   -- NCHW with spatial flattened onto the lane axis
    w1_ref: (C, Cr)     float32   -- first Linear weight (already transposed: y = p @ w1)
    w2_ref: (Cr, C)     float32   -- second Linear weight (y = h @ w2)
    y_ref : (1, C, HW)  float32
    """
    x = x_ref[...]                                            # (1, C, HW)

    # ---- global average pool over spatial (lane reduction) ----
    p = jnp.mean(x, axis=-1)                                  # (1, C)

    # ---- squeeze-excite MLP (tiny, f32) ----
    h1 = jnp.maximum(
        jnp.dot(p, w1_ref[...], preferred_element_type=jnp.float32), 0.0)      # (1, Cr)
    wgt = jax.nn.sigmoid(
        jnp.dot(h1, w2_ref[...], preferred_element_type=jnp.float32))          # (1, C)

    # ---- broadcast channel scaling: one VPU multiply, one lane-dense store ----
    y_ref[...] = x * wgt[:, :, None]


def ca_layer(x_nchw, params):
    """x_nchw: (B, C, H, W) float32. Returns x * sigmoid(MLP(avgpool(x))), NCHW."""
    B, C, H, W = x_nchw.shape
    HW = H * W
    x = x_nchw.reshape(B, C, HW).astype(jnp.float32)          # no transpose needed
    w1 = params["w1"].astype(jnp.float32)                     # (C, Cr)
    w2 = params["w2"].astype(jnp.float32)                     # (Cr, C)
    Cr = w1.shape[1]

    # NOTE: for very large H*W one would split the spatial axis into a stats pass
    # (accumulate the per-(b,c) sum) followed by a scaling pass; at these sizes a
    # whole (C, H*W) tile per batch fits comfortably in VMEM on all generations.
    y = pl.pallas_call(
        ca_layer_kernel,
        out_shape=jax.ShapeDtypeStruct((B, C, HW), jnp.float32),
        grid_spec=pltpu.PrefetchScalarGridSpec(
            num_scalar_prefetch=0,
            grid=(B,),
            in_specs=[
                pl.BlockSpec((1, C, HW), lambda b: (b, 0, 0)),   # one batch per step
                pl.BlockSpec((C, Cr), lambda b: (0, 0)),         # full weight, reused
                pl.BlockSpec((Cr, C), lambda b: (0, 0)),
            ],
            out_specs=pl.BlockSpec((1, C, HW), lambda b: (b, 0, 0)),
        ),
        compiler_params=pltpu.CompilerParams(
            dimension_semantics=("parallel",)),                  # megacore on v7x
    )(x, w1, w2)

    return y.reshape(B, C, H, W)


def ca_layer_reference(x, params):
    """Pure-JAX reference mirroring the PyTorch CALayer forward (NCHW)."""
    p = x.mean(axis=(2, 3))                                   # (B, C)
    h1 = jnp.maximum(p @ params["w1"], 0.0)                   # (B, Cr)
    wgt = jax.nn.sigmoid(h1 @ params["w2"])                   # (B, C)
    return x * wgt[:, :, None, None]


def make_params(key, channels, reduction=16):
    cr = max(channels // reduction, 1)
    k1, k2 = jax.random.split(key)
    return {
        # stored pre-transposed relative to torch.nn.Linear.weight, so y = x @ w
        "w1": 0.2 * jax.random.normal(k1, (channels, cr), jnp.float32),
        "w2": 0.2 * jax.random.normal(k2, (cr, channels), jnp.float32),
    }


if __name__ == "__main__":
    key = jax.random.PRNGKey(0)
    kx, kp = jax.random.split(key)

    # reduction=16 requires channels >= 16 for a non-empty bottleneck; use 32.
    B, C, H, W = 2, 32, 16, 16
    x = jax.random.normal(kx, (B, C, H, W), jnp.float32)
    params = make_params(kp, C, reduction=16)

    y = jax.jit(ca_layer)(x, params)
    jax.block_until_ready(y)

    y_ref = ca_layer_reference(x, params)
    np.testing.assert_allclose(np.asarray(y), np.asarray(y_ref), rtol=1e-5, atol=1e-5)
    assert y.shape == (B, C, H, W)

    print("KERNEL_OK")
</pallas_src>

<mosaic_0001>
module attributes {stable_mosaic.version = 11 : i64} {
  func.func @ca_layer_kernel(%arg0: i32, %arg1: memref<1x32x256xf32, #tpu.memory_space<vmem>>, %arg2: memref<32x2xf32, #tpu.memory_space<vmem>>, %arg3: memref<2x32xf32, #tpu.memory_space<vmem>>, %arg4: memref<1x32x256xf32, #tpu.memory_space<vmem>>) attributes {dimension_semantics = [#tpu.dimension_semantics<parallel>], iteration_bounds = array<i64: 2>, scalar_prefetch = 0 : i64, scratch_operands = 0 : i64, tpu.core_type = #tpu.core_type<tc>, window_params = [{transform_indices = @transform_0, window_bounds = array<i64: 1, 32, 256>}, {pipeline_mode = #tpu.pipeline_mode<synchronous>, transform_indices = @transform_1, window_bounds = array<i64: 32, 2>}, {pipeline_mode = #tpu.pipeline_mode<synchronous>, transform_indices = @transform_2, window_bounds = array<i64: 2, 32>}, {transform_indices = @transform_3, window_bounds = array<i64: 1, 32, 256>}]} {
    %c0 = arith.constant 0 : index
    %c0_0 = arith.constant 0 : index
    %c0_1 = arith.constant 0 : index
    %0 = vector.load %arg1[%c0, %c0_0, %c0_1] : memref<1x32x256xf32, #tpu.memory_space<vmem>>, vector<1x32x256xf32>
    %cst = arith.constant dense<0.000000e+00> : vector<1x32xf32>
    %1 = vector.multi_reduction <add>, %0, %cst [2] : vector<1x32x256xf32> to vector<1x32xf32>
    %cst_2 = arith.constant 2.560000e+02 : f32
    %2 = vector.broadcast %cst_2 : f32 to vector<1x32xf32>
    %3 = arith.divf %1, %2 : vector<1x32xf32>
    %c0_3 = arith.constant 0 : index
    %c0_4 = arith.constant 0 : index
    %4 = vector.load %arg2[%c0_3, %c0_4] : memref<32x2xf32, #tpu.memory_space<vmem>>, vector<32x2xf32>
    %cst_5 = arith.constant dense<0.000000e+00> : vector<1x2xf32>
    %5 = tpu.matmul %3, %4, %cst_5 {dimension_numbers = #tpu.dot_dimension_numbers<[1], [0], [0], [1], [0, 0, 1, 1], [], []>} : vector<1x32xf32>, vector<32x2xf32>, vector<1x2xf32> -> vector<1x2xf32>
    %cst_6 = arith.constant 0.000000e+00 : f32
    %6 = vector.broadcast %cst_6 : f32 to vector<1x2xf32>
    %7 = arith.maximumf %5, %6 : vector<1x2xf32>
    %c0_7 = arith.constant 0 : index
    %c0_8 = arith.constant 0 : index
    %8 = vector.load %arg3[%c0_7, %c0_8] : memref<2x32xf32, #tpu.memory_space<vmem>>, vector<2x32xf32>
    %cst_9 = arith.constant dense<0.000000e+00> : vector<1x32xf32>
    %9 = tpu.matmul %7, %8, %cst_9 {dimension_numbers = #tpu.dot_dimension_numbers<[1], [0], [0], [1], [0, 0, 1, 1], [], []>} : vector<1x2xf32>, vector<2x32xf32>, vector<1x32xf32> -> vector<1x32xf32>
    %10 = arith.negf %9 : vector<1x32xf32>
    %11 = math.exp %10 : vector<1x32xf32>
    %cst_10 = arith.constant 1.000000e+00 : f32
    %12 = vector.broadcast %cst_10 : f32 to vector<1x32xf32>
    %13 = arith.addf %12, %11 : vector<1x32xf32>
    %14 = arith.divf %12, %13 : vector<1x32xf32>
    %15 = vector.shape_cast %14 : vector<1x32xf32> to vector<1x32x1xf32>
    %16 = vector.broadcast %15 : vector<1x32x1xf32> to vector<1x32x256xf32>
    %17 = arith.mulf %0, %16 : vector<1x32x256xf32>
    %c0_11 = arith.constant 0 : index
    %c0_12 = arith.constant 0 : index
    %c0_13 = arith.constant 0 : index
    %18 = vector.load %arg4[%c0_11, %c0_12, %c0_13] : memref<1x32x256xf32, #tpu.memory_space<vmem>>, vector<1x32x256xf32>
    tpu.vector_store %arg4[%c0_11, %c0_12, %c0_13], %17 {strides = array<i32>} : memref<1x32x256xf32, #tpu.memory_space<vmem>>, vector<1x32x256xf32>,
    return
  }
  func.func @transform_0(%arg0: i32) -> (i32, i32, i32) {
    %c0_i32 = arith.constant 0 : i32
    %c0_i32_0 = arith.constant 0 : i32
    %c0_i32_1 = arith.constant 0 : i32
    return %arg0, %c0_i32, %c0_i32_0 : i32, i32, i32
  }
  func.func @transform_1(%arg0: i32) -> (i32, i32) {
    %c0_i32 = arith.constant 0 : i32
    %c0_i32_0 = arith.constant 0 : i32
    %c0_i32_1 = arith.constant 0 : i32
    return %c0_i32, %c0_i32_0 : i32, i32
  }
  func.func @transform_2(%arg0: i32) -> (i32, i32) {
    %c0_i32 = arith.constant 0 : i32
    %c0_i32_0 = arith.constant 0 : i32
    %c0_i32_1 = arith.constant 0 : i32
    return %c0_i32, %c0_i32_0 : i32, i32
  }
  func.func @transform_3(%arg0: i32) -> (i32, i32, i32) {
    %c0_i32 = arith.constant 0 : i32
    %c0_i32_0 = arith.constant 0 : i32
    %c0_i32_1 = arith.constant 0 : i32
    return %arg0, %c0_i32, %c0_i32_0 : i32, i32, i32
  }
}

</mosaic_0001>

<bundles_post_ra>
// kernel: ca_layer.1
= control target key start
LH: loop header
LB: loop body
LE: loop exit
PB: predicated region body
PF: predicated region fallthrough
CT: control target
= control target key end

     0   :  { %s572_s12 = smov 0   ;;  %s643_s0 = inlined_call_operand.vmem [shape: f32[2,32,256], index: 0, kind: input, shape index: {}]   ;;  %s644_s1 = inlined_call_operand.vmem [shape: f32[32,2], index: 1, kind: input, shape index: {}]   ;;  %s645_s2 = inlined_call_operand.vmem [shape: f32[2,32], index: 2, kind: input, shape index: {}]   ;;  %s646_s3 = inlined_call_operand.vmem [shape: f32[2,32,256], index: 3, kind: output, shape index: {}]  }
   0x1 LB: > { %s480_s13 = sadd.s32 4294967295, %s547_s12   ;;  %p484_p0 = scmp.ge.s32.totalorder %s547_s12, 1  ;;  %s547_s12 = sphi %s572_s12, %s13_s12  }
   0x2   : > { %p137_p1 = scmp.lt.s32.totalorder %s547_s12, 3 }
   0x4   : > { %p138_p2 = pnand %p484_p0, %p137_p1 }
   0x5   : > { %p161_p3 = scmp.lt.s32.totalorder (!%p138_p2), %s480_s13, 1  ;;  %v196_v12 = vld [vmem:[%s644_s1] sm:$0xff] (!%p138_p2)  ;;  %v197_v13 = vld [vmem:[%s644_s1 + $0x8] sm:$0xff] (!%p138_p2)  ;;  %v549_v15 = vmov (!%p138_p2), 0.0|0.0   ;;  %v198_v16 = vld [vmem:[%s644_s1 + $0x10] sm:$0xff] (!%p138_p2)  ;;  %vm550_vm0 = vmmov (!%p138_p2), 0   ;;  %v204_v20 = vlaneseq (!%p138_p2) }
   0x6   : > { %141 = sbr.rel (%p138_p2) target bundleno = 752 (0x2f0), region = 32  ;;  %v521_v14 = vpack.c.bf16 (!%p138_p2), %v197_v13, %v196_v12  ;;  %520 = vmatprep.subr.bf16.mxu0 (!%p138_p2), %v549_v15  ;;  %v199_v17 = vld [vmem:[%s644_s1 + $0x18] sm:$0xff] (!%p138_p2)  ;;  %v551_v19 = vmov (!%p138_p2), 0.0   ;;  %vm215_vm1 = vcmask (!%p138_p2), 130112   ;;  %vm222_vm2 = vcmask (!%p138_p2), 195712  }
   0x7   : > { %v524_v18 = vpack.c.bf16 (!%p138_p2), %v199_v17, %v198_v16  ;;  %512 = vmatprep.mubr.msk.f32.mxu0 (!%p138_p2), %vm550_vm0, %v551_v19  ;;  %515 = vmatprep.subr.mxu1 (!%p138_p2), %v551_v19  ;;  %v205_v21 = vand.u32 (!%p138_p2), 127, %v204_v20  ;;  %v207_v22 = vshrl.u32 (!%p138_p2), %v204_v20, 7  ;;  %vm229_vm3 = vcmask (!%p138_p2), 261312   ;;  %v305_v45 = vld [vmem:[%s645_s2] sm:$0x3] (!%p138_p2) }
   0x8   : > { %522 = vmatpush3.bf16.msra.mxu0 (!%p138_p2), %v521_v14  ;;  %517 = vmatprep.mubr.msk.f32.mxu1 (!%p138_p2), %vm550_vm0, %v551_v19  ;;  %vm231_vm4 = vcmask (!%p138_p2), 261120   ;;  %vm310_vm5 = vcmask (!%p138_p2), 1041408   ;;  %vm306_vm6 = vcmask (!%p138_p2), 15360  }
   0x9   : > { %523 = vmatprep.subr.bf16.mxu0 (!%p138_p2), %v549_v15  ;;  %v210_v23 = vadd.s32 (!%p138_p2), 4294967288, %v205_v21  ;;  %v217_v25 = vadd.s32 (!%p138_p2), 4294967280, %v205_v21  ;;  %v224_v26 = vadd.s32 (!%p138_p2), 4294967272, %v205_v21  ;;  %v208_v28 = vsub.s32 (!%p138_p2), %v205_v21, %v207_v22  ;;  %516 = vmatpush3.msk.msra.mxu1 (!%p138_p2), %vm310_vm5, %v305_v45 }
   0xa   : > { %v392_v54 = vsub.s32 (!%p138_p2), 0, %v207_v22 }
   0xb   : > { %v213_v30 = vsub.s32 (!%p138_p2), %v210_v23, %v207_v22  ;;  %v220_v31 = vsub.s32 (!%p138_p2), %v217_v25, %v207_v22  ;;  %v227_v34 = vsub.s32 (!%p138_p2), %v224_v26, %v207_v22 }
   0xc   : > { %525 = vmatpush3.bf16.msra.mxu0 (!%p138_p2), %v524_v18 }
   0xd   : > { %s648_s13 = smov (!%p161_p3, %s480_s13), 1 }
   0xe   : > { %s495_s14 = sshll.u32 %s648_s13, 6 }
   0xf   : > { %s165_s17 = scalar_lea.vmem %s643_s0, %s495_s14  ;;  %s170_s30 = scalar_lea.vmem %s646_s3, %s495_s14 }
  0x10   : > { %v588_v0 = vld [vmem:[%s165_s17] sm:$0xff]  ;;  %v590_v1 = vld [vmem:[%s165_s17 + $0x8] sm:$0xff]  ;;  %v598_v5 = vld [vmem:[%s165_s17 + $0x10] sm:$0xff] }
  0x11   : > { %v592_v2 = vld [vmem:[%s165_s17 + $0x20] sm:$0xff]  ;;  %v179_v3 = vadd.f32 %v590_v1, %v588_v0  ;;  %v596_v4 = vld [vmem:[%s165_s17 + $0x28] sm:$0xff]  ;;  %v600_v6 = vld [vmem:[%s165_s17 + $0x18] sm:$0xff] }
  0x12   : > { %v185_v7 = vadd.f32 %v596_v4, %v592_v2  ;;  %v604_v8 = vld [vmem:[%s165_s17 + $0x30] sm:$0xff]  ;;  %v606_v9 = vld [vmem:[%s165_s17 + $0x38] sm:$0xff]  ;;  %v182_v10 = vadd.f32 %v600_v6, %v598_v5 }
  0x13   : > { %180 = vadd.xlane.f32.xlu0 %v179_v3  ;;  %v188_v11 = vadd.f32 %v606_v9, %v604_v8 }
  0x14   : > { %186 = vadd.xlane.f32.xlu1 %v185_v7 }
  0x17   : > { %183 = vadd.xlane.f32.xlu0 %v182_v10 }
  0x18   : > { %189 = vadd.xlane.f32.xlu1 %v188_v11 }
  0xa0   : > { %v181_v24 = vpop.xlane.xlu0 %180 }
  0xa1   : > { %v187_v27 = vpop.xlane.xlu1 %186  ;;  %v192_v29 = vmul.f32 0.00390625, %v181_v24 }
  0xa2   : > { %v194_v32 = vmul.f32 0.00390625, %v187_v27 }
  0xa3   : > { %v209_v38 = vrot.slane %v192_v29, %v208_v28 }
  0xa4   : > { %v184_v33 = vpop.xlane.xlu0 %183  ;;  %v221_v40 = vrot.slane %v194_v32, %v220_v31 }
  0xa5   : > { %v193_v35 = vmul.f32 0.00390625, %v184_v33  ;;  %v190_v36 = vpop.xlane.xlu1 %189 }
  0xa6   : > { %v195_v37 = vmul.f32 0.00390625, %v190_v36 }
  0xa7   : > { %v214_v39 = vrot.slane %v193_v35, %v213_v30 }
  0xa8   : > { %v228_v41 = vrot.slane %v195_v37, %v227_v34 }
  0xa9   : > { %v216_v42 = vsel %vm215_vm1, %v214_v39, %v209_v38 }
  0xaa   : > { %v223_v43 = vsel %vm222_vm2, %v221_v40, %v216_v42 }
  0xab   : > { %v230_v44 = vsel %vm229_vm3, %v228_v41, %v223_v43 }
  0xac   : > { %513 = vmatmul.mubr.msk.f32.vlgmr.msra.gmra.mrb[0].mxu0 %vm231_vm4, %v230_v44 }
 0x17f   : > { %v300_v46 = vpop.f32.mrb[0].mxu0 }
 0x180   : > { %v304_v47 = vmax.f32 %v300_v46, 0.0  ;;  %v514_v48 = vpop.f32.mrb[1].mxu0 }
 0x182   : > { %518 = vmatmul.mubr.msk.f32.vlgmr.msra.gmra.mrb[0].mxu1 %vm306_vm6, %v304_v47 }
 0x255   : > { %v380_v49 = vpop.f32.mrb[0].mxu1 }
 0x256   : > { %v492_v50 = vmul.f32 -1.442695, %v380_v49  ;;  %v519_v51 = vpop.f32.mrb[1].mxu1 }
 0x258   : > { %537 = vpow2.f32 %v492_v50 }
 0x262   : > { %v538_v52 = vpop.eup %537 }
 0x263   : > { %v387_v53 = vadd.f32 1.0, %v538_v52 }
 0x265   : > { %539 = vrcp.f32 %v387_v53 }
 0x26f   : > { %v540_v55 = vpop.eup %539 }
 0x270   : > { %v393_v56 = vrot.slane %v540_v55, %v392_v54 }
 0x272   : > { %399 = vbcast.lane.b32.xlu1 %v393_v56, 264  ;;  %395 = vbcast.lane.b32.xlu0 %v393_v56, 256 }
 0x276   : > { %403 = vbcast.lane.b32.xlu1 %v393_v56, 272 }
 0x27a   : > { %407 = vbcast.lane.b32.xlu1 %v393_v56, 280 }
 0x2e4   : > { %v400_v57 = vpop.permute.xlu1 %399  ;;  %v396_v58 = vpop.permute.xlu0 %395 }
 0x2e5   : > { %v411_v59 = vmul.f32 %v400_v57, %v598_v5  ;;  %v412_v60 = vmul.f32 %v400_v57, %v600_v6  ;;  %v409_v61 = vmul.f32 %v396_v58, %v588_v0  ;;  %v410_v62 = vmul.f32 %v396_v58, %v590_v1 }
 0x2e7   : > { %419 = vst [vmem:[%s170_s30 + $0x10] sm:$0xff] %v411_v59  ;;  %420 = vst [vmem:[%s170_s30 + $0x18] sm:$0xff] %v412_v60 }
 0x2e8   : > { %417 = vst [vmem:[%s170_s30] sm:$0xff] %v409_v61  ;;  %418 = vst [vmem:[%s170_s30 + $0x8] sm:$0xff] %v410_v62  ;;  %v404_v63 = vpop.permute.xlu1 %403 }
 0x2e9   : > { %v413_v3 = vmul.f32 %v404_v63, %v592_v2  ;;  %v414_v7 = vmul.f32 %v404_v63, %v596_v4 }
 0x2eb   : > { %421 = vst [vmem:[%s170_s30 + $0x20] sm:$0xff] %v413_v3  ;;  %422 = vst [vmem:[%s170_s30 + $0x28] sm:$0xff] %v414_v7 }
 0x2ec   : > { %v408_v10 = vpop.permute.xlu1 %407 }
 0x2ed   : > { %v415_v5 = vmul.f32 %v408_v10, %v604_v8  ;;  %v416_v6 = vmul.f32 %v408_v10, %v606_v9 }
 0x2ef   : > { %423 = vst [vmem:[%s170_s30 + $0x30] sm:$0xff] %v415_v5  ;;  %424 = vst [vmem:[%s170_s30 + $0x38] sm:$0xff] %v416_v6 }
 0x2f0 PF: > { %s13_s12 = sadd.s32 1, %s547_s12  }
 0x2f1   : > { %p10_p4 = scmp.ge.s32.totalorder %s13_s12, 4  }
 0x2f3   :  { %12 = sbr.rel (!%p10_p4) target bundleno = 1 (0x1), region = 62 }

</bundles_post_ra>
